<compile_context>
chip_gen: v6e
topology: v6e:2x2x1
jax: 0.10.0
libtpu: 0.0.40
codegen_flags: <defaults>
</compile_context>

<pallas_src>
import jax
import jax.numpy as jnp
from jax.experimental import pallas as pl
from jax.experimental.pallas import tpu as pltpu

FEAT_C, FEAT_H, FEAT_W = 32, 6, 6
IN_FEATURES = FEAT_C * FEAT_H * FEAT_W     # 1152 (multiple of 128 -> dense vregs)
HIDDEN = 128
OUT_FEATURES = 32
OUT_PAD = 128                              # lane-dense padded output width
TILE_N_MAX = 1024                          # safe on v5e (16 MiB scoped) / v6e / v7x (64 MiB)


def _round_up(x, m):
    return (x + m - 1) // m * m


def eye_fc_kernel(x_ref, w1_ref, b1_ref, w2_ref, b2_ref, o_ref):
    # x_ref:  (tile_n, 1152) bf16   w1_ref: (1152, 128) bf16   b1_ref: (1, 128) f32
    # w2_ref: (128, 128)     bf16   b2_ref: (1, 128)    f32    o_ref:  (tile_n, 128) f32
    h = jnp.dot(x_ref[...], w1_ref[...], preferred_element_type=jnp.float32) + b1_ref[...]
    h = jnp.maximum(h, 0.0)                                     # ReLU
    y = jnp.dot(h.astype(jnp.bfloat16), w2_ref[...],
                preferred_element_type=jnp.float32) + b2_ref[...]
    o_ref[...] = jnp.maximum(y, 0.0)                            # ReLU (padded cols stay 0)


def eye_fc_forward(feats, w1, b1, w2, b2, *, tile_n=TILE_N_MAX):
    """feats: (N, 32, 6, 6) or (N, 1152); returns (N, 32) float32."""
    n = feats.shape[0]
    x2 = feats.reshape(n, -1)
    assert x2.shape[1] == IN_FEATURES

    # bf16 operands for the MXU; f32 accumulation happens inside the kernel.
    x2 = x2.astype(jnp.bfloat16)
    w1 = w1.astype(jnp.bfloat16)

    # Zero-pad the second layer to a full 128-lane output so the kernel's output
    # stores are unmasked and lane-dense.
    w2p = jnp.zeros((HIDDEN, OUT_PAD), jnp.bfloat16).at[:, :OUT_FEATURES].set(
        w2.astype(jnp.bfloat16))
    b2p = jnp.zeros((1, OUT_PAD), jnp.float32).at[:, :OUT_FEATURES].set(
        b2.reshape(1, OUT_FEATURES).astype(jnp.float32))
    b1 = b1.reshape(1, HIDDEN).astype(jnp.float32)

    tile = min(tile_n, _round_up(max(n, 1), 8))
    grid = (pl.cdiv(n, tile),)

    flops = 2 * n * (IN_FEATURES * HIDDEN + HIDDEN * OUT_PAD)
    bytes_accessed = (x2.size * 2 + w1.size * 2 + b1.size * 4
                      + w2p.size * 2 + b2p.size * 4 + n * OUT_PAD * 4)

    out = pl.pallas_call(
        eye_fc_kernel,
        out_shape=jax.ShapeDtypeStruct((n, OUT_PAD), jnp.float32),
        grid=grid,
        in_specs=[
            pl.BlockSpec((tile, IN_FEATURES), lambda i: (i, 0)),    # x: tiled over batch
            pl.BlockSpec((IN_FEATURES, HIDDEN), lambda i: (0, 0)),  # w1: resident
            pl.BlockSpec((1, HIDDEN), lambda i: (0, 0)),            # b1
            pl.BlockSpec((HIDDEN, OUT_PAD), lambda i: (0, 0)),      # w2 (padded)
            pl.BlockSpec((1, OUT_PAD), lambda i: (0, 0)),           # b2 (padded)
        ],
        out_specs=pl.BlockSpec((tile, OUT_PAD), lambda i: (i, 0)),
        compiler_params=pltpu.CompilerParams(
            dimension_semantics=("parallel",)),
        cost_estimate=pl.CostEstimate(
            flops=flops, transcendentals=0, bytes_accessed=bytes_accessed),
    )(x2, w1, b1, w2p, b2p)

    return out[:, :OUT_FEATURES]


def init_params(key):
    """Deterministic synthetic parameters matching nn.Linear shapes.

    PyTorch stores Linear weight as (out, in); kept transposed (in, out) here so the
    kernel computes x @ W + b directly on the MXU.
    """
    k1, k2, k3, k4 = jax.random.split(key, 4)
    bound1 = 1.0 / jnp.sqrt(IN_FEATURES)
    bound2 = 1.0 / jnp.sqrt(HIDDEN)
    w1 = jax.random.uniform(k1, (IN_FEATURES, HIDDEN), jnp.float32, -bound1, bound1)
    b1 = jax.random.uniform(k2, (1, HIDDEN), jnp.float32, -bound1, bound1)
    w2 = jax.random.uniform(k3, (HIDDEN, OUT_FEATURES), jnp.float32, -bound2, bound2)
    b2 = jax.random.uniform(k4, (1, OUT_FEATURES), jnp.float32, -bound2, bound2)
    return w1, b1, w2, b2


def reference_forward(feats, w1, b1, w2, b2):
    """Plain-JAX reference (same bf16 operand precision as the kernel)."""
    x2 = feats.reshape(feats.shape[0], -1).astype(jnp.bfloat16)
    h = jnp.dot(x2, w1.astype(jnp.bfloat16), preferred_element_type=jnp.float32) + b1
    h = jnp.maximum(h, 0.0)
    y = jnp.dot(h.astype(jnp.bfloat16), w2.astype(jnp.bfloat16),
                preferred_element_type=jnp.float32) + b2
    return jnp.maximum(y, 0.0)


if __name__ == "__main__":
    key = jax.random.PRNGKey(0)
    kx, kp = jax.random.split(key)

    batch = 2
    # Flattened-feature input to the fc head (what self.features(...) would produce).
    feats = jax.random.uniform(kx, (batch, FEAT_C, FEAT_H, FEAT_W), jnp.float32)
    w1, b1, w2, b2 = init_params(kp)

    out = eye_fc_forward(feats, w1, b1, w2, b2)
    out = jax.block_until_ready(out)

    ref = reference_forward(feats, w1, b1, w2, b2)
    assert out.shape == (batch, OUT_FEATURES)
    assert jnp.allclose(out, ref, atol=2e-3, rtol=2e-3), "mismatch vs JAX reference"

    print("KERNEL_OK")
</pallas_src>

<mosaic_0001>
module attributes {stable_mosaic.version = 11 : i64} {
  func.func @eye_fc_kernel(%arg0: i32, %arg1: memref<8x1152xbf16, #tpu.memory_space<vmem>>, %arg2: memref<1152x128xbf16, #tpu.memory_space<vmem>>, %arg3: memref<1x128xf32, #tpu.memory_space<vmem>>, %arg4: memref<128x128xbf16, #tpu.memory_space<vmem>>, %arg5: memref<1x128xf32, #tpu.memory_space<vmem>>, %arg6: memref<8x128xf32, #tpu.memory_space<vmem>>) attributes {dimension_semantics = [#tpu.dimension_semantics<parallel>], iteration_bounds = array<i64: 1>, scalar_prefetch = 0 : i64, scratch_operands = 0 : i64, tpu.core_type = #tpu.core_type<tc>, window_params = [{transform_indices = @transform_0, window_bounds = array<i64: 8, 1152>}, {pipeline_mode = #tpu.pipeline_mode<synchronous>, transform_indices = @transform_1, window_bounds = array<i64: 1152, 128>}, {pipeline_mode = #tpu.pipeline_mode<synchronous>, transform_indices = @transform_2, window_bounds = array<i64: 1, 128>}, {pipeline_mode = #tpu.pipeline_mode<synchronous>, transform_indices = @transform_3, window_bounds = array<i64: 128, 128>}, {pipeline_mode = #tpu.pipeline_mode<synchronous>, transform_indices = @transform_4, window_bounds = array<i64: 1, 128>}, {transform_indices = @transform_5, window_bounds = array<i64: 8, 128>}]} {
    %c0 = arith.constant 0 : index
    %c0_0 = arith.constant 0 : index
    %0 = vector.load %arg1[%c0, %c0_0] : memref<8x1152xbf16, #tpu.memory_space<vmem>>, vector<8x1152xbf16>
    %c0_1 = arith.constant 0 : index
    %c0_2 = arith.constant 0 : index
    %1 = vector.load %arg2[%c0_1, %c0_2] : memref<1152x128xbf16, #tpu.memory_space<vmem>>, vector<1152x128xbf16>
    %cst = arith.constant dense<0.000000e+00> : vector<8x128xf32>
    %2 = tpu.matmul %0, %1, %cst {dimension_numbers = #tpu.dot_dimension_numbers<[1], [0], [0], [1], [0, 0, 1, 1], [], []>} : vector<8x1152xbf16>, vector<1152x128xbf16>, vector<8x128xf32> -> vector<8x128xf32>
    %c0_3 = arith.constant 0 : index
    %c0_4 = arith.constant 0 : index
    %3 = vector.load %arg3[%c0_3, %c0_4] : memref<1x128xf32, #tpu.memory_space<vmem>>, vector<1x128xf32>
    %4 = vector.broadcast %3 : vector<1x128xf32> to vector<8x128xf32>
    %5 = arith.addf %2, %4 : vector<8x128xf32>
    %cst_5 = arith.constant 0.000000e+00 : f32
    %6 = vector.broadcast %cst_5 : f32 to vector<8x128xf32>
    %7 = arith.maximumf %5, %6 : vector<8x128xf32>
    %8 = arith.truncf %7 : vector<8x128xf32> to vector<8x128xbf16>
    %c0_6 = arith.constant 0 : index
    %c0_7 = arith.constant 0 : index
    %9 = vector.load %arg4[%c0_6, %c0_7] : memref<128x128xbf16, #tpu.memory_space<vmem>>, vector<128x128xbf16>
    %cst_8 = arith.constant dense<0.000000e+00> : vector<8x128xf32>
    %10 = tpu.matmul %8, %9, %cst_8 {dimension_numbers = #tpu.dot_dimension_numbers<[1], [0], [0], [1], [0, 0, 1, 1], [], []>} : vector<8x128xbf16>, vector<128x128xbf16>, vector<8x128xf32> -> vector<8x128xf32>
    %c0_9 = arith.constant 0 : index
    %c0_10 = arith.constant 0 : index
    %11 = vector.load %arg5[%c0_9, %c0_10] : memref<1x128xf32, #tpu.memory_space<vmem>>, vector<1x128xf32>
    %12 = vector.broadcast %11 : vector<1x128xf32> to vector<8x128xf32>
    %13 = arith.addf %10, %12 : vector<8x128xf32>
    %cst_11 = arith.constant 0.000000e+00 : f32
    %14 = vector.broadcast %cst_11 : f32 to vector<8x128xf32>
    %15 = arith.maximumf %13, %14 : vector<8x128xf32>
    %c0_12 = arith.constant 0 : index
    %c0_13 = arith.constant 0 : index
    %16 = vector.load %arg6[%c0_12, %c0_13] : memref<8x128xf32, #tpu.memory_space<vmem>>, vector<8x128xf32>
    tpu.vector_store %arg6[%c0_12, %c0_13], %15 {strides = array<i32>} : memref<8x128xf32, #tpu.memory_space<vmem>>, vector<8x128xf32>,
    return
  }
  func.func @transform_0(%arg0: i32) -> (i32, i32) {
    %c0_i32 = arith.constant 0 : i32
    %c0_i32_0 = arith.constant 0 : i32
    return %arg0, %c0_i32 : i32, i32
  }
  func.func @transform_1(%arg0: i32) -> (i32, i32) {
    %c0_i32 = arith.constant 0 : i32
    %c0_i32_0 = arith.constant 0 : i32
    %c0_i32_1 = arith.constant 0 : i32
    return %c0_i32, %c0_i32_0 : i32, i32
  }
  func.func @transform_2(%arg0: i32) -> (i32, i32) {
    %c0_i32 = arith.constant 0 : i32
    %c0_i32_0 = arith.constant 0 : i32
    %c0_i32_1 = arith.constant 0 : i32
    return %c0_i32, %c0_i32_0 : i32, i32
  }
  func.func @transform_3(%arg0: i32) -> (i32, i32) {
    %c0_i32 = arith.constant 0 : i32
    %c0_i32_0 = arith.constant 0 : i32
    %c0_i32_1 = arith.constant 0 : i32
    return %c0_i32, %c0_i32_0 : i32, i32
  }
  func.func @transform_4(%arg0: i32) -> (i32, i32) {
    %c0_i32 = arith.constant 0 : i32
    %c0_i32_0 = arith.constant 0 : i32
    %c0_i32_1 = arith.constant 0 : i32
    return %c0_i32, %c0_i32_0 : i32, i32
  }
  func.func @transform_5(%arg0: i32) -> (i32, i32) {
    %c0_i32 = arith.constant 0 : i32
    %c0_i32_0 = arith.constant 0 : i32
    return %arg0, %c0_i32 : i32, i32
  }
}

</mosaic_0001>

<bundles_post_ra>
// kernel: tpu_custom_call.1
= control target key start
LH: loop header
LB: loop body
LE: loop exit
PB: predicated region body
PF: predicated region fallthrough
CT: control target
= control target key end

     0   :  { %10 = vsyncpa [#allocation3], 0  ;;  %s1599_s0 = inlined_call_operand.hbm [shape: bf16[2,1152], index: 0, kind: input, shape index: {}]   ;;  %s1600_s1 = inlined_call_operand.hbm [shape: bf16[1152,128], index: 1, kind: input, shape index: {}]   ;;  %s1601_s2 = inlined_call_operand.vmem [shape: f32[1,128], index: 2, kind: input, shape index: {}]   ;;  %s1602_s3 = inlined_call_operand.hbm [shape: bf16[128,128], index: 3, kind: input, shape index: {}]   ;;  %s1603_s4 = inlined_call_operand.vmem [shape: f32[1,128], index: 4, kind: input, shape index: {}]   ;;  %s1604_s5 = inlined_call_operand.hbm [shape: f32[2,128], index: 5, kind: output, shape index: {}]  }
   0x1   :  { %11 = vsyncpa [#allocation6], 0 }
   0x2   :  { %12 = vsyncpa [#allocation4], 0 }
   0x3   :  { %17 = vsyncadd [#allocation3], 432  ;;  %s1511_s18 = smov [#allocation5]  }
   0x4   :  { %s30_s19 = sshll.u32 %s1511_s18, 4  ;;  %s31_s19 = int_to_ptr.vmem [resolvable:$true] %s30_s19 }
   0x5   :  { %s1433_s20 = scalar_lea.vmem %s31_s19, 9216  ;;  %p1438_p1 = scmp.lt.s32.totalorder %s31_s19, %s31_s19 }
   0x6   :  { %p1434_p0 = scmp.ne.s32.totalorder %s31_s19, %s1433_s20  ;;  %p1439_p2 = scmp.lt.s32.totalorder %s1433_s20, %s1433_s20 }
   0x8   :  { %p1440_p3 = por %p1439_p2, %p1438_p1 }
   0xa   :  { %p1441_p4 = pnand %p1440_p3, %p1434_p0 }
   0xc   :  { %1444 = shalt.err (!%p1441_p4)
}
   0xd   :  { %s1512_s21 = smov 64   ;;  %s1513_s22 = smov 4  }
   0xe   :  { %36 = dma.hbm_to_vmem [thread:$0]  %s1600_s1, 9216, %s31_s19, [#allocation6], %s1512_s21, %s1512_s21, %s1513_s22  }
   0xf   :  { %s1514_s25 = smov [#allocation2]  }
  0x10   :  { %s18_s26 = sshll.u32 %s1514_s25, 4  ;;  %s19_s26 = int_to_ptr.vmem [resolvable:$true] %s18_s26 }
  0x11   :  { %s1453_s27 = scalar_lea.vmem %s19_s26, 144  ;;  %s1457_s28 = scalar_lea.vmem %s19_s26, 576 }
  0x12   :  { %p1454_p5 = scmp.ne.s32.totalorder %s19_s26, %s1453_s27  ;;  %p1458_p6 = scmp.lt.s32.totalorder %s19_s26, %s19_s26 }
  0x13   :  { %p1459_p7 = scmp.lt.s32.totalorder %s1457_s28, %s1453_s27 }
  0x15   :  { %p1460_p8 = por %p1459_p7, %p1458_p6 }
  0x17   :  { %p1461_p9 = pnand %p1460_p8, %p1454_p5 }
  0x19   :  { %1464 = shalt.err (!%p1461_p9)
}
  0x1a   :  { %s1515_s29 = smov 144   ;;  %s1516_s30 = smov 9  }
  0x1b   :  { %24 = dma.hbm_to_vmem [thread:$0]  %s1599_s0, 144, %s19_s26, [#allocation3], %s1515_s29, %s1515_s29, %s1516_s30  }
  0x1c   :  { %s1517_s8 = smov [#allocation7]  }
  0x1d   :  { %s44_s9 = sshll.u32 %s1517_s8, 4  ;;  %s45_s9 = int_to_ptr.vmem [resolvable:$true] %s44_s9 }
  0x1e   :  { %s1473_s1 = scalar_lea.vmem %s45_s9, 1024  ;;  %p1478_p11 = scmp.lt.s32.totalorder %s45_s9, %s45_s9 }
  0x1f   :  { %p1474_p10 = scmp.ne.s32.totalorder %s45_s9, %s1473_s1  ;;  %p1479_p12 = scmp.lt.s32.totalorder %s1473_s1, %s1473_s1 }
  0x21   :  { %p1480_p13 = por %p1479_p12, %p1478_p11 }
  0x23   :  { %p1481_p0 = pnand %p1480_p13, %p1474_p10 }
  0x25   :  { %1484 = shalt.err (!%p1481_p0)
}
  0x26   :  { %50 = dma.hbm_to_vmem [thread:$0]  %s1602_s3, 1024, %s45_s9, [#allocation6], %s1512_s21, %s1512_s21, %s1513_s22  }
  0x27   :  { %1505 = dma.done.wait [#allocation3], 576  }
  0x28   :  { %1506 = vsyncadd [#allocation3], 4294966720 }
  0x29   :  { %1507 = dma.done.wait [#allocation6], 10240  }
  0x2a   :  { %1508 = vsyncadd [#allocation6], 4294957056  ;;  %v1337_v0 = vld [vmem:[#allocation5 + $0x78] sm:$0xff]   ;;  %v1341_v4 = vld [vmem:[#allocation5 + $0x70] sm:$0xff]   ;;  %v1518_v23 = vmov 1966171168   ;;  %v237_v25 = vlaneseq }
  0x2b   :  { %v1338_v1 = vld [vmem:[#allocation5 + $0x38] sm:$0xff]   ;;  %1178 = vmatprep.subr.bf16.mxu0 %v1337_v0  ;;  %v1342_v5 = vld [vmem:[#allocation5 + $0x30] sm:$0xff]   ;;  %v1345_v8 = vld [vmem:[#allocation5 + $0x68] sm:$0xff]   ;;  %v235_v24 = vunpack.c.l.s4 %v1518_v23  ;;  %vm1520_vm0 = vmmov 0  }
  0x2c   :  { %v1339_v2 = vld [vmem:[#allocation5 + $0xf8] sm:$0xff]   ;;  %1179 = vmatpush3.bf16.msra.mxu0 %v1338_v1  ;;  %v1343_v6 = vld [vmem:[#allocation5 + $0xf0] sm:$0xff]   ;;  %v1346_v9 = vld [vmem:[#allocation5 + $0x28] sm:$0xff]   ;;  %v238_v31 = vshrl.u32 %v237_v25, 7 }
  0x2d   :  { %v1340_v3 = vld [vmem:[#allocation5 + $0xb8] sm:$0xff]   ;;  %1200 = vmatprep.subr.bf16.mxu1 %v1339_v2  ;;  %1180 = vmatprep.subr.bf16.mxu0 %v1341_v4  ;;  %v1344_v7 = vld [vmem:[#allocation5 + $0xb0] sm:$0xff]   ;;  %v1347_v10 = vld [vmem:[#allocation5 + $0xe8] sm:$0xff]   ;;  %v236_v30 = vunpack.c.0.s8 %v235_v24 }
  0x2e   :  { %1201 = vmatpush3.bf16.msra.mxu1 %v1340_v3  ;;  %v1348_v11 = vld [vmem:[#allocation5 + $0xa8] sm:$0xff]   ;;  %v1349_v12 = vld [vmem:[#allocation5 + $0x60] sm:$0xff]   ;;  %v1353_v16 = vld [vmem:[#allocation5 + $0x58] sm:$0xff]  }
  0x2f   :  { %1202 = vmatprep.subr.bf16.mxu1 %v1343_v6  ;;  %v1350_v13 = vld [vmem:[#allocation5 + $0x20] sm:$0xff]   ;;  %v1354_v17 = vld [vmem:[#allocation5 + $0x18] sm:$0xff]   ;;  %v1357_v20 = vld [vmem:[#allocation5 + $0x50] sm:$0xff]   ;;  %v1569_v36 = vsub.s32 %v236_v30, %v238_v31 }
  0x30   :  { %1181 = vmatpush3.bf16.msra.mxu0 %v1342_v5  ;;  %v1351_v14 = vld [vmem:[#allocation5 + $0xe0] sm:$0xff]   ;;  %v1355_v18 = vld [vmem:[#allocation5 + $0xd8] sm:$0xff]   ;;  %v1358_v21 = vld [vmem:[#allocation5 + $0x10] sm:$0xff]  }
  0x31   :  { %1182 = vmatprep.subr.bf16.mxu0 %v1345_v8  ;;  %v1352_v15 = vld [vmem:[#allocation5 + $0xa0] sm:$0xff]   ;;  %v1356_v19 = vld [vmem:[#allocation5 + $0x98] sm:$0xff]   ;;  %v1359_v22 = vld [vmem:[#allocation5 + $0xd0] sm:$0xff]  }
  0x32   :  { %1203 = vmatpush3.bf16.msra.mxu1 %v1344_v7  ;;  %v1360_v26 = vld [vmem:[#allocation5 + $0x90] sm:$0xff]   ;;  %v1361_v27 = vld [vmem:[#allocation5 + $0x48] sm:$0xff]   ;;  %v1365_v33 = vld [vmem:[#allocation5 + $0x40] sm:$0xff]  }
  0x33   :  { %1204 = vmatprep.subr.bf16.mxu1 %v1347_v10  ;;  %v1362_v28 = vld [vmem:[#allocation5 + $0x8] sm:$0xff]   ;;  %v1366_v34 = vld [vmem:[#allocation5] sm:$0xff]   ;;  %v1373_v40 = vld [vmem:[#allocation2 + $0x16] ss:$9 sps:$4 sm:$0xff]  }
  0x34   :  { %1183 = vmatpush3.bf16.msra.mxu0 %v1346_v9  ;;  %v1363_v29 = vld [vmem:[#allocation5 + $0xc8] sm:$0xff]   ;;  %v1367_v35 = vld [vmem:[#allocation5 + $0xc0] sm:$0xff]   ;;  %v1375_v45 = vld [vmem:[#allocation5 + $0x178] sm:$0xff]   ;;  %v1577_v46 = vrot.slane %v1373_v40, %v1569_v36 }
  0x35   :  { %1184 = vmatprep.subr.bf16.mxu0 %v1349_v12  ;;  %v1364_v32 = vld [vmem:[#allocation5 + $0x88] sm:$0xff]   ;;  %v1374_v42 = vld [vmem:[#allocation5 + $0x80] sm:$0xff]   ;;  %v1377_v49 = vld [vmem:[#allocation5 + $0x1f8] sm:$0xff]  }
  0x36   :  { %1205 = vmatpush3.bf16.msra.mxu1 %v1348_v11  ;;  %v1368_v37 = vld [vmem:[#allocation2] ss:$9 sps:$4 sm:$0xff]   ;;  %v1370_v38 = vld [vmem:[#allocation2 + $0x4] ss:$9 sps:$4 sm:$0xff]   ;;  %v1371_v39 = vld [vmem:[#allocation2 + $0x12] ss:$9 sps:$4 sm:$0xff]  }
  0x37   :  { %1206 = vmatprep.subr.bf16.mxu1 %v1351_v14  ;;  %v240_v41 = vrot.slane %v1368_v37, %v1569_v36  ;;  %v1573_v43 = vrot.slane %v1370_v38, %v1569_v36  ;;  %v254_v44 = vrot.slane %v1371_v39, %v1569_v36  ;;  %v1376_v53 = vld [vmem:[#allocation5 + $0x138] sm:$0xff]   ;;  %v1379_v55 = vld [vmem:[#allocation5 + $0x170] sm:$0xff]   ;;  %v1383_v62 = vld [vmem:[#allocation5 + $0x168] sm:$0xff]  }
  0x38   :  { %1185 = vmatpush3.bf16.msra.mxu0 %v1350_v13  ;;  %v1378_v58 = vld [vmem:[#allocation5 + $0x1b8] sm:$0xff]   ;;  %v1381_v59 = vld [vmem:[#allocation5 + $0x1f0] sm:$0xff]   ;;  %v1385_v0 = vld [vmem:[#allocation5 + $0x1e8] sm:$0xff]  }
  0x39   :  { %1186 = vmatprep.subr.bf16.mxu0 %v1353_v16  ;;  %v263_v47 = vcombine.high %v240_v41, %v254_v44  ;;  %v262_v48 = vcombine.low %v240_v41, %v254_v44  ;;  %v265_v50 = vcombine.high %v1573_v43, %v1577_v46  ;;  %v1380_v61 = vld [vmem:[#allocation5 + $0x130] sm:$0xff]   ;;  %v1384_v1 = vld [vmem:[#allocation5 + $0x128] sm:$0xff]   ;;  %v1387_v2 = vld [vmem:[#allocation5 + $0x160] sm:$0xff]  }
  0x3a   :  { %1207 = vmatpush3.bf16.msra.mxu1 %v1352_v15  ;;  %v1382_v63 = vld [vmem:[#allocation5 + $0x1b0] sm:$0xff]   ;;  %v1386_v3 = vld [vmem:[#allocation5 + $0x1a8] sm:$0xff]   ;;  %v1389_v4 = vld [vmem:[#allocation5 + $0x1e0] sm:$0xff]  }
  0x3b   :  { %1208 = vmatprep.subr.bf16.mxu1 %v1355_v18  ;;  %v286_v51 = vrot.slane %v263_v47, %v1569_v36  ;;  %v272_v52 = vrot.slane %v262_v48, %v1569_v36  ;;  %v293_v54 = vrot.slane %v265_v50, %v1569_v36  ;;  %v1388_v5 = vld [vmem:[#allocation5 + $0x120] sm:$0xff]   ;;  %v1391_v6 = vld [vmem:[#allocation5 + $0x158] sm:$0xff]   ;;  %v1395_v10 = vld [vmem:[#allocation5 + $0x150] sm:$0xff]  }
  0x3c   :  { %1187 = vmatpush3.bf16.msra.mxu0 %v1354_v17  ;;  %v1390_v7 = vld [vmem:[#allocation5 + $0x1a0] sm:$0xff]   ;;  %v1393_v8 = vld [vmem:[#allocation5 + $0x1d8] sm:$0xff]   ;;  %v1397_v12 = vld [vmem:[#allocation5 + $0x1d0] sm:$0xff]  }
  0x3d   :  { %1188 = vmatprep.subr.bf16.mxu0 %v1357_v20  ;;  %795 = vmatprep.mubr.bf16.mxu0 %v286_v51  ;;  %v296_v56 = vcombine.high %v286_v51, %v286_v51  ;;  %v294_v57 = vcombine.high %v272_v52, %v272_v52  ;;  %v297_v60 = vcombine.high %v293_v54, %v293_v54  ;;  %v1392_v9 = vld [vmem:[#allocation5 + $0x118] sm:$0xff]   ;;  %v1396_v13 = vld [vmem:[#allocation5 + $0x110] sm:$0xff]   ;;  %v1399_v14 = vld [vmem:[#allocation5 + $0x148] sm:$0xff]  }
  0x3e   :  { %1209 = vmatpush3.bf16.msra.mxu1 %v1356_v19  ;;  %v1394_v11 = vld [vmem:[#allocation5 + $0x198] sm:$0xff]   ;;  %v1398_v15 = vld [vmem:[#allocation5 + $0x190] sm:$0xff]   ;;  %v1401_v16 = vld [vmem:[#allocation5 + $0x1c8] sm:$0xff]   ;;  %v264_v19 = vcombine.low %v1573_v43, %v1577_v46 }
  0x3f   :  { %1210 = vmatprep.subr.bf16.mxu1 %v1359_v22  ;;  %835 = vmatprep.mubr.bf16.mxu1 %v296_v56  ;;  %v1400_v17 = vld [vmem:[#allocation5 + $0x108] sm:$0xff]   ;;  %v1403_v18 = vld [vmem:[#allocation5 + $0x140] sm:$0xff]   ;;  %v1407_v25 = vld [vmem:[#allocation5 + $0x238] sm:$0xff]  }
  0x40   :  { %1189 = vmatpush3.bf16.msra.mxu0 %v1358_v21  ;;  %v1402_v20 = vld [vmem:[#allocation5 + $0x188] sm:$0xff]   ;;  %v1405_v21 = vld [vmem:[#allocation5 + $0x1c0] sm:$0xff]   ;;  %v279_v23 = vrot.slane %v264_v19, %v1569_v36  ;;  %v1411_v31 = vld [vmem:[#allocation5 + $0x218] sm:$0xff]  }
  0x41   :  { %1190 = vmatprep.subr.bf16.mxu0 %v1361_v27  ;;  %v1404_v22 = vld [vmem:[#allocation5 + $0x100] sm:$0xff]   ;;  %v1413_v38 = vld [vmem:[#allocation5 + $0x208] sm:$0xff]   ;;  %v1418_v43 = vld [vmem:[#allocation7 + $0x30] sm:$0xff]  }
  0x42   :  { %1211 = vmatpush3.bf16.msra.mxu1 %v1360_v26  ;;  %v1406_v24 = vld [vmem:[#allocation5 + $0x180] sm:$0xff]   ;;  %v1519_v26 = vmov 0.0   ;;  %v295_v27 = vcombine.high %v279_v23, %v279_v23  ;;  %v1419_v44 = vld [vmem:[#allocation7 + $0x28] sm:$0xff]   ;;  %v1421_v46 = vld [vmem:[#allocation7 + $0x18] sm:$0xff]  }
  0x43   :  { %1212 = vmatprep.subr.bf16.mxu1 %v1363_v29  ;;  %v1409_v29 = vld [vmem:[#allocation5 + $0x228] sm:$0xff]   ;;  %v1410_v30 = vld [vmem:[#allocation5 + $0x220] sm:$0xff]   ;;  %v1422_v47 = vld [vmem:[#allocation7 + $0x10] sm:$0xff]  }
  0x44   :  { %1191 = vmatpush3.bf16.msra.mxu0 %v1362_v28  ;;  %v1408_v28 = vld [vmem:[#allocation5 + $0x230] sm:$0xff]   ;;  %v1414_v40 = vld [vmem:[#allocation5 + $0x200] sm:$0xff]  }
  0x45   :  { %1192 = vmatprep.subr.bf16.mxu0 %v1365_v33  ;;  %v1416_v33 = vld [vmem:[#allocation2 + $0x1a] ss:$9 sps:$4 sm:$0x11]   ;;  %v1424_v48 = vld [vmem:[#allocation7] sm:$0xff]  }
  0x46   :  { %1213 = vmatpush3.bf16.msra.mxu1 %v1364_v32  ;;  %v1415_v32 = vld [vmem:[#allocation2 + $0x8] ss:$9 sps:$4 sm:$0x11]   ;;  %v313_v37 = vrot.slane %v1416_v33, %v1569_v36 }
  0x47   :  { %1214 = vmatprep.subr.bf16.mxu1 %v1367_v35  ;;  %v306_v35 = vrot.slane %v1415_v32, %v1569_v36 }
  0x48   :  { %1193 = vmatpush3.bf16.msra.mxu0 %v1366_v34  ;;  %v1412_v34 = vld [vmem:[#allocation5 + $0x210] sm:$0xff]  }
  0x49   :  { %1222 = vmatprep.subr.bf16.mxu0 %v1375_v45  ;;  %v314_v39 = vcombine.low %v306_v35, %v313_v37  ;;  %v1420_v45 = vld [vmem:[#allocation7 + $0x20] sm:$0xff]  }
  0x4a   :  { %1215 = vmatpush3.bf16.msra.mxu1 %v1374_v42  ;;  %v1417_v42 = vld [vmem:[#allocation7 + $0x38] sm:$0xff]  }
  0x4b   :  { %1244 = vmatprep.subr.bf16.mxu1 %v1377_v49  ;;  %796 = vmatmul.mubr.bf16.vlgmr.msra.gmra.mxu0 %v272_v52  ;;  %v321_v41 = vrot.slane %v314_v39, %v1569_v36  ;;  %v1423_v36 = vld [vmem:[#allocation7 + $0x8] sm:$0xff]  }
  0x4c   :  { %1223 = vmatpush3.bf16.msra.mxu0 %v1376_v53  ;;  %875 = vmatprep.mubr.bf16.mxu0 %v293_v54 }
  0x4d   :  { %836 = vmatmul.mubr.bf16.vlgmr.msra.gmra.mxu1 %v294_v57  ;;  %1224 = vmatprep.subr.bf16.mxu0 %v1379_v55 }
  0x4e   :  { %1245 = vmatpush3.bf16.msra.mxu1 %v1378_v58  ;;  %915 = vmatprep.mubr.bf16.mxu1 %v297_v60 }
  0x4f   :  { %1246 = vmatprep.subr.bf16.mxu1 %v1381_v59 }
  0x50   :  { %1225 = vmatpush3.bf16.msra.mxu0 %v1380_v61 }
  0x51   :  { %1226 = vmatprep.subr.bf16.mxu0 %v1383_v62 }
  0x52   :  { %1247 = vmatpush3.bf16.msra.mxu1 %v1382_v63 }
  0x53   :  { %1248 = vmatprep.subr.bf16.mxu1 %v1385_v0 }
  0x54   :  { %1227 = vmatpush3.bf16.msra.mxu0 %v1384_v1 }
  0x55   :  { %1228 = vmatprep.subr.bf16.mxu0 %v1387_v2  ;;  %v1096_v2 = vld [vmem:[%s1601_s2] ss:$0 sm:$0xff] }
  0x56   :  { %1249 = vmatpush3.bf16.msra.mxu1 %v1386_v3 }
  0x57   :  { %1250 = vmatprep.subr.bf16.mxu1 %v1389_v4 }
  0x58   :  { %1229 = vmatpush3.bf16.msra.mxu0 %v1388_v5 }
  0x59   :  { %1230 = vmatprep.subr.bf16.mxu0 %v1391_v6 }
  0x5a   :  { %1251 = vmatpush3.bf16.msra.mxu1 %v1390_v7 }
  0x5b   :  { %1252 = vmatprep.subr.bf16.mxu1 %v1393_v8 }
  0x5c   :  { %1231 = vmatpush3.bf16.msra.mxu0 %v1392_v9 }
  0x5d   :  { %1232 = vmatprep.subr.bf16.mxu0 %v1395_v10 }
  0x5e   :  { %1253 = vmatpush3.bf16.msra.mxu1 %v1394_v11 }
  0x5f   :  { %1254 = vmatprep.subr.bf16.mxu1 %v1397_v12 }
  0x60   :  { %1233 = vmatpush3.bf16.msra.mxu0 %v1396_v13 }
  0x61   :  { %1234 = vmatprep.subr.bf16.mxu0 %v1399_v14 }
  0x62   :  { %1255 = vmatpush3.bf16.msra.mxu1 %v1398_v15 }
  0x63   :  { %1256 = vmatprep.subr.bf16.mxu1 %v1401_v16 }
  0x64   :  { %1235 = vmatpush3.bf16.msra.mxu0 %v1400_v17  ;;  %v1169_v17 = vld [vmem:[%s1603_s4] ss:$0 sm:$0xff] }
  0x65   :  { %1236 = vmatprep.subr.bf16.mxu0 %v1403_v18 }
  0x66   :  { %1257 = vmatpush3.bf16.msra.mxu1 %v1402_v20 }
  0x67   :  { %1258 = vmatprep.subr.bf16.mxu1 %v1405_v21 }
  0x68   :  { %1237 = vmatpush3.bf16.msra.mxu0 %v1404_v22 }
  0x69   :  { %1284 = vmatprep.subr.bf16.mxu0 %v1519_v26 }
  0x6a   :  { %1259 = vmatpush3.bf16.msra.mxu1 %v1406_v24 }
  0x6b   :  { %876 = vmatmul.mubr.bf16.vlgmr.msra.gmra.mxu0 %v279_v23  ;;  %1304 = vmatprep.subr.bf16.mxu1 %v1519_v26 }
  0x6c   :  { %1285 = vmatpush3.bf16.msra.mxu0 %v1407_v25  ;;  %1300 = vmatprep.mubr.msk.bf16.mxu0 %vm1520_vm0, %v1519_v26 }
  0x6d   :  { %916 = vmatmul.mubr.bf16.vlgmr.msra.gmra.mxu1 %v295_v27  ;;  %1286 = vmatprep.subr.bf16.mxu0 %v1519_v26 }
  0x6e   :  { %1320 = vmatprep.mubr.msk.bf16.mxu1 %vm1520_vm0, %v1519_v26  ;;  %1305 = vmatpush3.bf16.msra.mxu1 %v1417_v42 }
  0x6f   :  { %1306 = vmatprep.subr.bf16.mxu1 %v1519_v26 }
  0x70   :  { %1287 = vmatpush3.bf16.msra.mxu0 %v1408_v28 }
  0x71   :  { %1288 = vmatprep.subr.bf16.mxu0 %v1519_v26 }
  0x72   :  { %1307 = vmatpush3.bf16.msra.mxu1 %v1418_v43 }
  0x73   :  { %1308 = vmatprep.subr.bf16.mxu1 %v1519_v26 }
  0x74   :  { %1289 = vmatpush3.bf16.msra.mxu0 %v1409_v29 }
  0x75   :  { %1290 = vmatprep.subr.bf16.mxu0 %v1519_v26 }
  0x76   :  { %1309 = vmatpush3.bf16.msra.mxu1 %v1419_v44 }
  0x77   :  { %1310 = vmatprep.subr.bf16.mxu1 %v1519_v26 }
  0x78   :  { %1291 = vmatpush3.bf16.msra.mxu0 %v1410_v30 }
  0x79   :  { %1292 = vmatprep.subr.bf16.mxu0 %v1519_v26 }
  0x7a   :  { %1311 = vmatpush3.bf16.msra.mxu1 %v1420_v45 }
  0x7b   :  { %1312 = vmatprep.subr.bf16.mxu1 %v1519_v26 }
  0x7c   :  { %1293 = vmatpush3.bf16.msra.mxu0 %v1411_v31 }
  0x7d   :  { %1294 = vmatprep.subr.bf16.mxu0 %v1519_v26 }
  0x7e   :  { %1313 = vmatpush3.bf16.msra.mxu1 %v1421_v46 }
  0x7f   :  { %1314 = vmatprep.subr.bf16.mxu1 %v1519_v26 }
  0x80   :  { %1295 = vmatpush3.bf16.msra.mxu0 %v1412_v34 }
  0x81   :  { %1296 = vmatprep.subr.bf16.mxu0 %v1519_v26 }
  0x82   :  { %1315 = vmatpush3.bf16.msra.mxu1 %v1422_v47 }
  0x83   :  { %1316 = vmatprep.subr.bf16.mxu1 %v1519_v26 }
  0x84   :  { %1297 = vmatpush3.bf16.msra.mxu0 %v1413_v38 }
  0x85   :  { %1298 = vmatprep.subr.bf16.mxu0 %v1519_v26 }
  0x86   :  { %1317 = vmatpush3.bf16.msra.mxu1 %v1423_v36 }
  0x87   :  { %1318 = vmatprep.subr.bf16.mxu1 %v1519_v26 }
  0x88   :  { %1299 = vmatpush3.bf16.msra.mxu0 %v1414_v40 }
  0x8a   :  { %1319 = vmatpush3.bf16.msra.mxu1 %v1424_v48 }
  0x8b   :  { %1301 = vmatmul.mubr.bf16.vlgmr.msra.gmra.mxu0 %v321_v41 }
 0x10b   :  { %v1194_v49 = vpop.f32.mrf.mxu0 }
 0x10d   :  { %v1195_v50 = vpop.f32.mrf.mxu0  ;;  %v1216_v51 = vpop.f32.mrf.mxu1 }
 0x10e   :  { %v1196_v1 = vadd.f32 %v1195_v50, %v1194_v49 }
 0x10f   :  { %v1197_v52 = vpop.f32.mrf.mxu0  ;;  %v1217_v53 = vpop.f32.mrf.mxu1 }
 0x110   :  { %v798_v3 = vadd.f32 %v1196_v1, %v1096_v2  ;;  %v1218_v4 = vadd.f32 %v1217_v53, %v1216_v51 }
 0x111   :  { %v1198_v54 = vpop.f32.mrf.mxu0  ;;  %v1219_v55 = vpop.f32.mrf.mxu1 }
 0x112   :  { %v838_v6 = vadd.f32 %v1218_v4, %v798_v3 }
 0x113   :  { %v1220_v56 = vpop.f32.mrf.mxu1 }
 0x12b   :  { %v1238_v57 = vpop.f32.mrf.mxu0 }
 0x12d   :  { %v1239_v58 = vpop.f32.mrf.mxu0  ;;  %v1260_v59 = vpop.f32.mrf.mxu1 }
 0x12e   :  { %v1240_v5 = vadd.f32 %v1239_v58, %v1238_v57 }
 0x12f   :  { %v1241_v60 = vpop.f32.mrf.mxu0  ;;  %v1261_v61 = vpop.f32.mrf.mxu1 }
 0x130   :  { %v878_v7 = vadd.f32 %v1240_v5, %v838_v6  ;;  %v1262_v8 = vadd.f32 %v1261_v61, %v1260_v59 }
 0x131   :  { %v1242_v62 = vpop.f32.mrf.mxu0  ;;  %v1263_v63 = vpop.f32.mrf.mxu1 }
 0x132   :  { %v918_v9 = vadd.f32 %v1262_v8, %v878_v7 }
 0x133   :  { %v1264_v0 = vpop.f32.mrf.mxu1 }
 0x14b   :  { %v957_v10 = vpop.f32.mrf.mxu0 }
 0x14c   :  { %v958_v11 = vadd.f32 %v957_v10, %v918_v9 }
 0x14d   :  { %v1302_v12 = vpop.f32.mrf.mxu0 }
 0x14e   :  { %v963_v13 = vmax.f32 %v958_v11, 0.0 }
 0x14f   :  { %v960_v14 = vpop.f32.mrf.mxu0 }
 0x150   :  { %v964_v15 = vpack.c.bf16 %v963_v13, %v963_v13 }
 0x151   :  { %v1303_v16 = vpop.f32.mrf.mxu0 }
 0x152   :  { %1321 = vmatmul.mubr.bf16.vlgmr.msra.gmra.mxu1 %v964_v15 }
 0x212   :  { %v1070_v18 = vpop.f32.mrf.mxu1 }
 0x213   :  { %v1071_v19 = vadd.f32 %v1169_v17, %v1070_v18 }
 0x214   :  { %v1322_v20 = vpop.f32.mrf.mxu1 }
 0x215   :  { %v1076_v21 = vmax.f32 %v1071_v19, 0.0 }
 0x216   :  { %v1073_v22 = vpop.f32.mrf.mxu1 }
 0x217   :  { %1077 = vst [vmem:[#allocation8] sm:$0xff] %v1076_v21 }
 0x218   :  { %v1323_v23 = vpop.f32.mrf.mxu1 }
 0x219   :  { %1082 = vsyncadd [#allocation4], 96  ;;  %s1521_s2 = smov [#allocation8]  }
 0x21a   :  { %s1083_s14 = sshll.u32 %s1521_s2, 4  ;;  %s1084_s14 = int_to_ptr.vmem [resolvable:$true] %s1083_s14 }
 0x21b   :  { %s1485_s15 = scalar_lea.vmem %s1084_s14, 32  ;;  %s1489_s16 = scalar_lea.vmem %s1084_s14, 128 }
 0x21c   :  { %p1486_p1 = scmp.ne.s32.totalorder %s1084_s14, %s1485_s15  ;;  %p1490_p2 = scmp.lt.s32.totalorder %s1084_s14, %s1084_s14 }
 0x21d   :  { %p1491_p3 = scmp.lt.s32.totalorder %s1489_s16, %s1485_s15 }
 0x21f   :  { %p1492_p4 = por %p1491_p3, %p1490_p2 }
 0x221   :  { %p1493_p5 = pnand %p1492_p4, %p1486_p1 }
 0x223   :  { %1496 = shalt.err (!%p1493_p5)
}
 0x224   :  { %s1522_s4 = smov 32   ;;  %s1523_s17 = smov 2  }
 0x225   :  { %1089 = dma.vmem_to_hbm [thread:$0]  %s1084_s14, 32, %s1604_s5, [#allocation4], %s1522_s4, %s1522_s4, %s1523_s17  }
 0x226   :  { %1509 = dma.done.wait [#allocation4], 128  }
 0x227   :  { %1510 = vsyncadd [#allocation4], 4294967168 }
 0x228   :  { %1093 = vsyncpa [#allocation3], 1 }
 0x229   :  { %1094 = vsyncpa [#allocation6], 1 }
 0x22a   :  { %1095 = vsyncpa [#allocation4], 1 }

</bundles_post_ra>
